<compile_context>
chip_gen: v5e
topology: v5e:2x2
jax: 0.10.0
libtpu: 0.0.40
codegen_flags: <defaults>
</compile_context>

<pallas_src>
import functools
import math

import jax
import jax.numpy as jnp
import numpy as np
from jax import lax
from jax.experimental import pallas as pl
from jax.experimental.pallas import tpu as pltpu


# ------------------------------ Fused MHA kernel ------------------------------

# dot_general dimension numbers for "x @ w.T": contract dim 1 of x with dim 1 of w.
_DN_XWT = (((1,), (1,)), ((), ()))


def _mha_kernel(vl_ref,                       # SMEM scalar-prefetch: (B,) int32
                q_ref, k_ref, v_ref,          # (1, Lq, Dq), (1, Lk, Dk), (1, Lk, Dv)
                wq_ref, wk_ref, wv_ref,       # (H, Dq), (H, Dk), (H, Dv)
                wo_ref,                       # (H, H)
                o_ref,                        # (1, Lq, H)
                *, num_heads, head_dim):
    b = pl.program_id(0)

    xq = q_ref[0]                             # (Lq, Dq)
    xk = k_ref[0]                             # (Lk, Dk)
    xv = v_ref[0]                             # (Lk, Dv)

    # Q/K/V projections (nn.Linear, bias=False): x @ W.T on the MXU, f32 accum.
    qp = lax.dot_general(xq, wq_ref[...], _DN_XWT, preferred_element_type=jnp.float32)
    kp = lax.dot_general(xk, wk_ref[...], _DN_XWT, preferred_element_type=jnp.float32)
    vp = lax.dot_general(xv, wv_ref[...], _DN_XWT, preferred_element_type=jnp.float32)

    # Fold the 1/sqrt(d_head) score scale into q once (cheaper than scaling scores).
    qp = qp * jnp.float32(1.0 / math.sqrt(head_dim))

    Lq = qp.shape[0]
    Lk = kp.shape[0]

    vl = vl_ref[b]                            # per-sequence valid length (scalar)
    col = lax.broadcasted_iota(jnp.int32, (Lq, Lk), 1)
    valid = col < vl

    # Heads are contiguous column slices of the lane-dense projections
    # (exactly what transpose_qkv's reshape does). Static unroll over heads.
    ctx_heads = []
    for h in range(num_heads):
        lo, hi = h * head_dim, (h + 1) * head_dim
        qh = qp[:, lo:hi]                     # (Lq, dh)
        kh = kp[:, lo:hi]                     # (Lk, dh)
        vh = vp[:, lo:hi]                     # (Lk, dh)

        # scores = q @ k.T (scale already folded into q)
        s = lax.dot_general(qh, kh, _DN_XWT, preferred_element_type=jnp.float32)
        # masked_softmax: invalid positions get -1e6 before softmax
        s = jnp.where(valid, s, jnp.float32(-1e6))
        m = jnp.max(s, axis=-1, keepdims=True)
        e = jnp.exp(s - m)
        denom = jnp.sum(e, axis=-1, keepdims=True)
        p = e * pl.reciprocal(denom, approx=True)   # EUP reciprocal + broadcast mul
        # dropout (eval mode) is the identity
        ctx_heads.append(jnp.dot(p, vh, preferred_element_type=jnp.float32))

    # Concatenate heads along the lane axis == transpose_output, then W_o.
    ctx = jnp.concatenate(ctx_heads, axis=-1)             # (Lq, H), lane-dense
    out = lax.dot_general(ctx, wo_ref[...], _DN_XWT, preferred_element_type=jnp.float32)
    o_ref[0] = out.astype(o_ref.dtype)


def multihead_attention(queries, keys, values, valid_lens, params, num_heads):
    """Fused MultiHeadAttention forward: one pallas_call, grid over batch."""
    B, Lq, Dq = queries.shape
    _, Lk, Dk = keys.shape
    _, _, Dv = values.shape
    H = params["W_q"].shape[0]
    head_dim = H // num_heads
    vl = valid_lens.astype(jnp.int32)

    kernel = functools.partial(_mha_kernel, num_heads=num_heads, head_dim=head_dim)

    return pl.pallas_call(
        kernel,
        out_shape=jax.ShapeDtypeStruct((B, Lq, H), queries.dtype),
        grid_spec=pltpu.PrefetchScalarGridSpec(
            num_scalar_prefetch=1,
            grid=(B,),
            in_specs=[
                pl.BlockSpec((1, Lq, Dq), lambda b, vl: (b, 0, 0)),
                pl.BlockSpec((1, Lk, Dk), lambda b, vl: (b, 0, 0)),
                pl.BlockSpec((1, Lk, Dv), lambda b, vl: (b, 0, 0)),
                pl.BlockSpec((H, Dq), lambda b, vl: (0, 0)),   # weights: same block
                pl.BlockSpec((H, Dk), lambda b, vl: (0, 0)),   # every step (no re-DMA)
                pl.BlockSpec((H, Dv), lambda b, vl: (0, 0)),
                pl.BlockSpec((H, H), lambda b, vl: (0, 0)),
            ],
            out_specs=pl.BlockSpec((1, Lq, H), lambda b, vl: (b, 0, 0)),
        ),
        compiler_params=pltpu.CompilerParams(
            dimension_semantics=("parallel",),        # shard batch across TCs (v7x)
            vmem_limit_bytes=32 * 1024 * 1024,        # explicit, safe on v5e/v6e/v7x
        ),
    )(vl, queries, keys, values,
      params["W_q"], params["W_k"], params["W_v"], params["W_o"])


# ------------------------------- Pure-JAX ref ---------------------------------

def reference(queries, keys, values, valid_lens, params, num_heads):
    def t_qkv(x):
        B, L, H = x.shape
        x = x.reshape(B, L, num_heads, H // num_heads).transpose(0, 2, 1, 3)
        return x.reshape(B * num_heads, L, H // num_heads)

    def t_out(x):
        BH, L, dh = x.shape
        x = x.reshape(BH // num_heads, num_heads, L, dh).transpose(0, 2, 1, 3)
        return x.reshape(BH // num_heads, L, num_heads * dh)

    q = t_qkv(queries @ params["W_q"].T)
    k = t_qkv(keys @ params["W_k"].T)
    v = t_qkv(values @ params["W_v"].T)
    vl = jnp.repeat(valid_lens.astype(jnp.int32), num_heads)
    d = q.shape[-1]
    scores = jnp.einsum("bqd,bkd->bqk", q, k) / math.sqrt(d)
    mask = jnp.arange(scores.shape[-1])[None, None, :] < vl[:, None, None]
    scores = jnp.where(mask, scores, -1e6)
    attn = jax.nn.softmax(scores, axis=-1)
    out = jnp.einsum("bqk,bkd->bqd", attn, v)
    return t_out(out) @ params["W_o"].T


# ----------------------------------- Main --------------------------------------

if __name__ == "__main__":
    num_hiddens, num_heads = 32, 4
    query_size = key_size = value_size = num_hiddens
    B, Lq, Lk = 2, 8, 8

    key = jax.random.PRNGKey(0)
    kq, kk, kv, ko, kx1, kx2, kx3 = jax.random.split(key, 7)

    def init_linear(k, out_dim, in_dim):
        bound = 1.0 / math.sqrt(in_dim)
        return jax.random.uniform(k, (out_dim, in_dim), jnp.float32, -bound, bound)

    params = {
        "W_q": init_linear(kq, num_hiddens, query_size),
        "W_k": init_linear(kk, num_hiddens, key_size),
        "W_v": init_linear(kv, num_hiddens, value_size),
        "W_o": init_linear(ko, num_hiddens, num_hiddens),
    }

    queries = jax.random.normal(kx1, (B, Lq, query_size), jnp.float32)
    keys = jax.random.normal(kx2, (B, Lk, key_size), jnp.float32)
    values = jax.random.normal(kx3, (B, Lk, value_size), jnp.float32)
    valid_lens = jnp.array([3, 5], dtype=jnp.int32)

    out = multihead_attention(queries, keys, values, valid_lens, params, num_heads)
    out = jax.block_until_ready(out)

    ref = reference(queries, keys, values, valid_lens, params, num_heads)
    # Tolerance covers the EUP approximate reciprocal in the softmax and the
    # XLA default-precision matmuls in the reference; semantic bugs would be O(1).
    np.testing.assert_allclose(np.asarray(out), np.asarray(ref), atol=2e-2, rtol=2e-2)

    print("KERNEL_OK")
</pallas_src>

<mosaic_0001>
module attributes {stable_mosaic.version = 11 : i64} {
  func.func @_mha_kernel(%arg0: i32, %arg1: memref<2xi32, #tpu.memory_space<smem>>, %arg2: memref<1x8x32xf32, #tpu.memory_space<vmem>>, %arg3: memref<1x8x32xf32, #tpu.memory_space<vmem>>, %arg4: memref<1x8x32xf32, #tpu.memory_space<vmem>>, %arg5: memref<32x32xf32, #tpu.memory_space<vmem>>, %arg6: memref<32x32xf32, #tpu.memory_space<vmem>>, %arg7: memref<32x32xf32, #tpu.memory_space<vmem>>, %arg8: memref<32x32xf32, #tpu.memory_space<vmem>>, %arg9: memref<1x8x32xf32, #tpu.memory_space<vmem>>) attributes {dimension_semantics = [#tpu.dimension_semantics<parallel>], iteration_bounds = array<i64: 2>, scalar_prefetch = 1 : i64, scratch_operands = 0 : i64, tpu.core_type = #tpu.core_type<tc>, window_params = [{transform_indices = @transform_0, window_bounds = array<i64: 1, 8, 32>}, {transform_indices = @transform_1, window_bounds = array<i64: 1, 8, 32>}, {transform_indices = @transform_2, window_bounds = array<i64: 1, 8, 32>}, {pipeline_mode = #tpu.pipeline_mode<synchronous>, transform_indices = @transform_3, window_bounds = array<i64: 32, 32>}, {pipeline_mode = #tpu.pipeline_mode<synchronous>, transform_indices = @transform_4, window_bounds = array<i64: 32, 32>}, {pipeline_mode = #tpu.pipeline_mode<synchronous>, transform_indices = @transform_5, window_bounds = array<i64: 32, 32>}, {pipeline_mode = #tpu.pipeline_mode<synchronous>, transform_indices = @transform_6, window_bounds = array<i64: 32, 32>}, {transform_indices = @transform_7, window_bounds = array<i64: 1, 8, 32>}]} {
    %c0 = arith.constant 0 : index
    %c0_0 = arith.constant 0 : index
    %c0_1 = arith.constant 0 : index
    %0 = vector.load %arg2[%c0, %c0_0, %c0_1] : memref<1x8x32xf32, #tpu.memory_space<vmem>>, vector<1x8x32xf32>
    %1 = vector.shape_cast %0 : vector<1x8x32xf32> to vector<8x32xf32>
    %c0_2 = arith.constant 0 : index
    %c0_3 = arith.constant 0 : index
    %c0_4 = arith.constant 0 : index
    %2 = vector.load %arg3[%c0_2, %c0_3, %c0_4] : memref<1x8x32xf32, #tpu.memory_space<vmem>>, vector<1x8x32xf32>
    %3 = vector.shape_cast %2 : vector<1x8x32xf32> to vector<8x32xf32>
    %c0_5 = arith.constant 0 : index
    %c0_6 = arith.constant 0 : index
    %c0_7 = arith.constant 0 : index
    %4 = vector.load %arg4[%c0_5, %c0_6, %c0_7] : memref<1x8x32xf32, #tpu.memory_space<vmem>>, vector<1x8x32xf32>
    %5 = vector.shape_cast %4 : vector<1x8x32xf32> to vector<8x32xf32>
    %c0_8 = arith.constant 0 : index
    %c0_9 = arith.constant 0 : index
    %6 = vector.load %arg5[%c0_8, %c0_9] : memref<32x32xf32, #tpu.memory_space<vmem>>, vector<32x32xf32>
    %cst = arith.constant dense<0.000000e+00> : vector<8x32xf32>
    %7 = tpu.matmul %1, %6, %cst {dimension_numbers = #tpu.dot_dimension_numbers<[1], [1], [0], [0], [0, 0, 1, 0], [], []>} : vector<8x32xf32>, vector<32x32xf32>, vector<8x32xf32> -> vector<8x32xf32>
    %c0_10 = arith.constant 0 : index
    %c0_11 = arith.constant 0 : index
    %8 = vector.load %arg6[%c0_10, %c0_11] : memref<32x32xf32, #tpu.memory_space<vmem>>, vector<32x32xf32>
    %cst_12 = arith.constant dense<0.000000e+00> : vector<8x32xf32>
    %9 = tpu.matmul %3, %8, %cst_12 {dimension_numbers = #tpu.dot_dimension_numbers<[1], [1], [0], [0], [0, 0, 1, 0], [], []>} : vector<8x32xf32>, vector<32x32xf32>, vector<8x32xf32> -> vector<8x32xf32>
    %c0_13 = arith.constant 0 : index
    %c0_14 = arith.constant 0 : index
    %10 = vector.load %arg7[%c0_13, %c0_14] : memref<32x32xf32, #tpu.memory_space<vmem>>, vector<32x32xf32>
    %cst_15 = arith.constant dense<0.000000e+00> : vector<8x32xf32>
    %11 = tpu.matmul %5, %10, %cst_15 {dimension_numbers = #tpu.dot_dimension_numbers<[1], [1], [0], [0], [0, 0, 1, 0], [], []>} : vector<8x32xf32>, vector<32x32xf32>, vector<8x32xf32> -> vector<8x32xf32>
    %cst_16 = arith.constant 0.353553385 : f32
    %12 = vector.broadcast %cst_16 : f32 to vector<8x32xf32>
    %13 = arith.mulf %7, %12 : vector<8x32xf32>
    %14 = arith.index_cast %arg0 : i32 to index
    %15 = memref.load %arg1[%14] : memref<2xi32, #tpu.memory_space<smem>>
    %16 = tpu.iota {dimensions = array<i32: 1>} : vector<8x8xi32>
    %17 = vector.broadcast %15 : i32 to vector<8x8xi32>
    %18 = arith.cmpi slt, %16, %17 : vector<8x8xi32>
    %19 = vector.extract_strided_slice %13 {offsets = [0, 0], sizes = [8, 8], strides = [1, 1]} : vector<8x32xf32> to vector<8x8xf32>
    %20 = vector.extract_strided_slice %9 {offsets = [0, 0], sizes = [8, 8], strides = [1, 1]} : vector<8x32xf32> to vector<8x8xf32>
    %21 = vector.extract_strided_slice %11 {offsets = [0, 0], sizes = [8, 8], strides = [1, 1]} : vector<8x32xf32> to vector<8x8xf32>
    %cst_17 = arith.constant dense<0.000000e+00> : vector<8x8xf32>
    %22 = tpu.matmul %19, %20, %cst_17 {dimension_numbers = #tpu.dot_dimension_numbers<[1], [1], [0], [0], [0, 0, 1, 0], [], []>} : vector<8x8xf32>, vector<8x8xf32>, vector<8x8xf32> -> vector<8x8xf32>
    %cst_18 = arith.constant -1.000000e+06 : f32
    %23 = vector.broadcast %cst_18 : f32 to vector<8x8xf32>
    %24 = arith.select %18, %22, %23 : vector<8x8xi1>, vector<8x8xf32>
    %cst_19 = arith.constant dense<0xFF800000> : vector<8xf32>
    %25 = vector.multi_reduction <maximumf>, %24, %cst_19 [1] : vector<8x8xf32> to vector<8xf32>
    %26 = vector.shape_cast %25 : vector<8xf32> to vector<8x1xf32>
    %27 = vector.broadcast %26 : vector<8x1xf32> to vector<8x8xf32>
    %28 = arith.subf %24, %27 : vector<8x8xf32>
    %29 = math.exp %28 : vector<8x8xf32>
    %cst_20 = arith.constant dense<0.000000e+00> : vector<8xf32>
    %30 = vector.multi_reduction <add>, %29, %cst_20 [1] : vector<8x8xf32> to vector<8xf32>
    %31 = vector.shape_cast %30 : vector<8xf32> to vector<8x1xf32>
    %32 = tpu.reciprocal %31 {approx = true} : vector<8x1xf32> -> vector<8x1xf32>
    %33 = vector.broadcast %32 : vector<8x1xf32> to vector<8x8xf32>
    %34 = arith.mulf %29, %33 : vector<8x8xf32>
    %cst_21 = arith.constant dense<0.000000e+00> : vector<8x8xf32>
    %35 = tpu.matmul %34, %21, %cst_21 {dimension_numbers = #tpu.dot_dimension_numbers<[1], [0], [0], [1], [0, 0, 1, 1], [], []>} : vector<8x8xf32>, vector<8x8xf32>, vector<8x8xf32> -> vector<8x8xf32>
    %36 = vector.extract_strided_slice %13 {offsets = [0, 8], sizes = [8, 8], strides = [1, 1]} : vector<8x32xf32> to vector<8x8xf32>
    %37 = vector.extract_strided_slice %9 {offsets = [0, 8], sizes = [8, 8], strides = [1, 1]} : vector<8x32xf32> to vector<8x8xf32>
    %38 = vector.extract_strided_slice %11 {offsets = [0, 8], sizes = [8, 8], strides = [1, 1]} : vector<8x32xf32> to vector<8x8xf32>
    %cst_22 = arith.constant dense<0.000000e+00> : vector<8x8xf32>
    %39 = tpu.matmul %36, %37, %cst_22 {dimension_numbers = #tpu.dot_dimension_numbers<[1], [1], [0], [0], [0, 0, 1, 0], [], []>} : vector<8x8xf32>, vector<8x8xf32>, vector<8x8xf32> -> vector<8x8xf32>
    %cst_23 = arith.constant -1.000000e+06 : f32
    %40 = vector.broadcast %cst_23 : f32 to vector<8x8xf32>
    %41 = arith.select %18, %39, %40 : vector<8x8xi1>, vector<8x8xf32>
    %cst_24 = arith.constant dense<0xFF800000> : vector<8xf32>
    %42 = vector.multi_reduction <maximumf>, %41, %cst_24 [1] : vector<8x8xf32> to vector<8xf32>
    %43 = vector.shape_cast %42 : vector<8xf32> to vector<8x1xf32>
    %44 = vector.broadcast %43 : vector<8x1xf32> to vector<8x8xf32>
    %45 = arith.subf %41, %44 : vector<8x8xf32>
    %46 = math.exp %45 : vector<8x8xf32>
    %cst_25 = arith.constant dense<0.000000e+00> : vector<8xf32>
    %47 = vector.multi_reduction <add>, %46, %cst_25 [1] : vector<8x8xf32> to vector<8xf32>
    %48 = vector.shape_cast %47 : vector<8xf32> to vector<8x1xf32>
    %49 = tpu.reciprocal %48 {approx = true} : vector<8x1xf32> -> vector<8x1xf32>
    %50 = vector.broadcast %49 : vector<8x1xf32> to vector<8x8xf32>
    %51 = arith.mulf %46, %50 : vector<8x8xf32>
    %cst_26 = arith.constant dense<0.000000e+00> : vector<8x8xf32>
    %52 = tpu.matmul %51, %38, %cst_26 {dimension_numbers = #tpu.dot_dimension_numbers<[1], [0], [0], [1], [0, 0, 1, 1], [], []>} : vector<8x8xf32>, vector<8x8xf32>, vector<8x8xf32> -> vector<8x8xf32>
    %53 = vector.extract_strided_slice %13 {offsets = [0, 16], sizes = [8, 8], strides = [1, 1]} : vector<8x32xf32> to vector<8x8xf32>
    %54 = vector.extract_strided_slice %9 {offsets = [0, 16], sizes = [8, 8], strides = [1, 1]} : vector<8x32xf32> to vector<8x8xf32>
    %55 = vector.extract_strided_slice %11 {offsets = [0, 16], sizes = [8, 8], strides = [1, 1]} : vector<8x32xf32> to vector<8x8xf32>
    %cst_27 = arith.constant dense<0.000000e+00> : vector<8x8xf32>
    %56 = tpu.matmul %53, %54, %cst_27 {dimension_numbers = #tpu.dot_dimension_numbers<[1], [1], [0], [0], [0, 0, 1, 0], [], []>} : vector<8x8xf32>, vector<8x8xf32>, vector<8x8xf32> -> vector<8x8xf32>
    %cst_28 = arith.constant -1.000000e+06 : f32
    %57 = vector.broadcast %cst_28 : f32 to vector<8x8xf32>
    %58 = arith.select %18, %56, %57 : vector<8x8xi1>, vector<8x8xf32>
    %cst_29 = arith.constant dense<0xFF800000> : vector<8xf32>
    %59 = vector.multi_reduction <maximumf>, %58, %cst_29 [1] : vector<8x8xf32> to vector<8xf32>
    %60 = vector.shape_cast %59 : vector<8xf32> to vector<8x1xf32>
    %61 = vector.broadcast %60 : vector<8x1xf32> to vector<8x8xf32>
    %62 = arith.subf %58, %61 : vector<8x8xf32>
    %63 = math.exp %62 : vector<8x8xf32>
    %cst_30 = arith.constant dense<0.000000e+00> : vector<8xf32>
    %64 = vector.multi_reduction <add>, %63, %cst_30 [1] : vector<8x8xf32> to vector<8xf32>
    %65 = vector.shape_cast %64 : vector<8xf32> to vector<8x1xf32>
    %66 = tpu.reciprocal %65 {approx = true} : vector<8x1xf32> -> vector<8x1xf32>
    %67 = vector.broadcast %66 : vector<8x1xf32> to vector<8x8xf32>
    %68 = arith.mulf %63, %67 : vector<8x8xf32>
    %cst_31 = arith.constant dense<0.000000e+00> : vector<8x8xf32>
    %69 = tpu.matmul %68, %55, %cst_31 {dimension_numbers = #tpu.dot_dimension_numbers<[1], [0], [0], [1], [0, 0, 1, 1], [], []>} : vector<8x8xf32>, vector<8x8xf32>, vector<8x8xf32> -> vector<8x8xf32>
    %70 = vector.extract_strided_slice %13 {offsets = [0, 24], sizes = [8, 8], strides = [1, 1]} : vector<8x32xf32> to vector<8x8xf32>
    %71 = vector.extract_strided_slice %9 {offsets = [0, 24], sizes = [8, 8], strides = [1, 1]} : vector<8x32xf32> to vector<8x8xf32>
    %72 = vector.extract_strided_slice %11 {offsets = [0, 24], sizes = [8, 8], strides = [1, 1]} : vector<8x32xf32> to vector<8x8xf32>
    %cst_32 = arith.constant dense<0.000000e+00> : vector<8x8xf32>
    %73 = tpu.matmul %70, %71, %cst_32 {dimension_numbers = #tpu.dot_dimension_numbers<[1], [1], [0], [0], [0, 0, 1, 0], [], []>} : vector<8x8xf32>, vector<8x8xf32>, vector<8x8xf32> -> vector<8x8xf32>
    %cst_33 = arith.constant -1.000000e+06 : f32
    %74 = vector.broadcast %cst_33 : f32 to vector<8x8xf32>
    %75 = arith.select %18, %73, %74 : vector<8x8xi1>, vector<8x8xf32>
    %cst_34 = arith.constant dense<0xFF800000> : vector<8xf32>
    %76 = vector.multi_reduction <maximumf>, %75, %cst_34 [1] : vector<8x8xf32> to vector<8xf32>
    %77 = vector.shape_cast %76 : vector<8xf32> to vector<8x1xf32>
    %78 = vector.broadcast %77 : vector<8x1xf32> to vector<8x8xf32>
    %79 = arith.subf %75, %78 : vector<8x8xf32>
    %80 = math.exp %79 : vector<8x8xf32>
    %cst_35 = arith.constant dense<0.000000e+00> : vector<8xf32>
    %81 = vector.multi_reduction <add>, %80, %cst_35 [1] : vector<8x8xf32> to vector<8xf32>
    %82 = vector.shape_cast %81 : vector<8xf32> to vector<8x1xf32>
    %83 = tpu.reciprocal %82 {approx = true} : vector<8x1xf32> -> vector<8x1xf32>
    %84 = vector.broadcast %83 : vector<8x1xf32> to vector<8x8xf32>
    %85 = arith.mulf %80, %84 : vector<8x8xf32>
    %cst_36 = arith.constant dense<0.000000e+00> : vector<8x8xf32>
    %86 = tpu.matmul %85, %72, %cst_36 {dimension_numbers = #tpu.dot_dimension_numbers<[1], [0], [0], [1], [0, 0, 1, 1], [], []>} : vector<8x8xf32>, vector<8x8xf32>, vector<8x8xf32> -> vector<8x8xf32>
    %87 = tpu.concatenate %35, %52, %69, %86 in 1 : vector<8x8xf32>, vector<8x8xf32>, vector<8x8xf32>, vector<8x8xf32> -> vector<8x32xf32>
    %c0_37 = arith.constant 0 : index
    %c0_38 = arith.constant 0 : index
    %88 = vector.load %arg8[%c0_37, %c0_38] : memref<32x32xf32, #tpu.memory_space<vmem>>, vector<32x32xf32>
    %cst_39 = arith.constant dense<0.000000e+00> : vector<8x32xf32>
    %89 = tpu.matmul %87, %88, %cst_39 {dimension_numbers = #tpu.dot_dimension_numbers<[1], [1], [0], [0], [0, 0, 1, 0], [], []>} : vector<8x32xf32>, vector<32x32xf32>, vector<8x32xf32> -> vector<8x32xf32>
    %c0_40 = arith.constant 0 : index
    %c0_41 = arith.constant 0 : index
    %c0_42 = arith.constant 0 : index
    %90 = vector.load %arg9[%c0_40, %c0_41, %c0_42] : memref<1x8x32xf32, #tpu.memory_space<vmem>>, vector<1x8x32xf32>
    %91 = vector.shape_cast %90 : vector<1x8x32xf32> to vector<8x32xf32>
    %92 = vector.shape_cast %89 : vector<8x32xf32> to vector<1x8x32xf32>
    tpu.vector_store %arg9[%c0_40, %c0_41, %c0_42], %92 {strides = array<i32>} : memref<1x8x32xf32, #tpu.memory_space<vmem>>, vector<1x8x32xf32>,
    return
  }
  func.func @transform_0(%arg0: i32, %arg1: memref<2xi32, #tpu.memory_space<smem>>) -> (i32, i32, i32) {
    %c0_i32 = arith.constant 0 : i32
    %c0_i32_0 = arith.constant 0 : i32
    %c0_i32_1 = arith.constant 0 : i32
    return %arg0, %c0_i32, %c0_i32_0 : i32, i32, i32
  }
  func.func @transform_1(%arg0: i32, %arg1: memref<2xi32, #tpu.memory_space<smem>>) -> (i32, i32, i32) {
    %c0_i32 = arith.constant 0 : i32
    %c0_i32_0 = arith.constant 0 : i32
    %c0_i32_1 = arith.constant 0 : i32
    return %arg0, %c0_i32, %c0_i32_0 : i32, i32, i32
  }
  func.func @transform_2(%arg0: i32, %arg1: memref<2xi32, #tpu.memory_space<smem>>) -> (i32, i32, i32) {
    %c0_i32 = arith.constant 0 : i32
    %c0_i32_0 = arith.constant 0 : i32
    %c0_i32_1 = arith.constant 0 : i32
    return %arg0, %c0_i32, %c0_i32_0 : i32, i32, i32
  }
  func.func @transform_3(%arg0: i32, %arg1: memref<2xi32, #tpu.memory_space<smem>>) -> (i32, i32) {
    %c0_i32 = arith.constant 0 : i32
    %c0_i32_0 = arith.constant 0 : i32
    %c0_i32_1 = arith.constant 0 : i32
    return %c0_i32, %c0_i32_0 : i32, i32
  }
  func.func @transform_4(%arg0: i32, %arg1: memref<2xi32, #tpu.memory_space<smem>>) -> (i32, i32) {
    %c0_i32 = arith.constant 0 : i32
    %c0_i32_0 = arith.constant 0 : i32
    %c0_i32_1 = arith.constant 0 : i32
    return %c0_i32, %c0_i32_0 : i32, i32
  }
  func.func @transform_5(%arg0: i32, %arg1: memref<2xi32, #tpu.memory_space<smem>>) -> (i32, i32) {
    %c0_i32 = arith.constant 0 : i32
    %c0_i32_0 = arith.constant 0 : i32
    %c0_i32_1 = arith.constant 0 : i32
    return %c0_i32, %c0_i32_0 : i32, i32
  }
  func.func @transform_6(%arg0: i32, %arg1: memref<2xi32, #tpu.memory_space<smem>>) -> (i32, i32) {
    %c0_i32 = arith.constant 0 : i32
    %c0_i32_0 = arith.constant 0 : i32
    %c0_i32_1 = arith.constant 0 : i32
    return %c0_i32, %c0_i32_0 : i32, i32
  }
  func.func @transform_7(%arg0: i32, %arg1: memref<2xi32, #tpu.memory_space<smem>>) -> (i32, i32, i32) {
    %c0_i32 = arith.constant 0 : i32
    %c0_i32_0 = arith.constant 0 : i32
    %c0_i32_1 = arith.constant 0 : i32
    return %arg0, %c0_i32, %c0_i32_0 : i32, i32, i32
  }
}

</mosaic_0001>

<bundles_post_ra>
// kernel: tpu_custom_call.1
= control target key start
LH: loop header
LB: loop body
LE: loop exit
PB: predicated region body
PF: predicated region fallthrough
CT: control target
= control target key end

     0   :  { %s1542_s30 = smov [#allocation3]   ;;  %s1916_s0 = inlined_call_operand.hbm [shape: s32[2], index: 0, kind: input, shape index: {}]   ;;  %s1917_s1 = inlined_call_operand.hbm [shape: f32[2,8,32], index: 1, kind: input, shape index: {}]   ;;  %s1918_s2 = inlined_call_operand.hbm [shape: f32[2,8,32], index: 2, kind: input, shape index: {}]   ;;  %s1919_s3 = inlined_call_operand.hbm [shape: f32[2,8,32], index: 3, kind: input, shape index: {}]   ;;  %s1920_s4 = inlined_call_operand.hbm [shape: f32[32,32], index: 4, kind: input, shape index: {}]   ;;  %s1921_s5 = inlined_call_operand.hbm [shape: f32[32,32], index: 5, kind: input, shape index: {}]   ;;  %s1922_s6 = inlined_call_operand.hbm [shape: f32[32,32], index: 6, kind: input, shape index: {}]   ;;  %s1923_s7 = inlined_call_operand.hbm [shape: f32[32,32], index: 7, kind: input, shape index: {}]   ;;  %s1924_s8 = inlined_call_operand.hbm [shape: f32[2,8,32], index: 8, kind: output, shape index: {}]  }
   0x1   :  { %1933 = sst [smem:[#allocation25_spill]] %s1918_s2  ;;  %s14_s29 = sshll.u32 %s1916_s0, 4  ;;  %s15_s29 = int_to_ptr.hbm [resolvable:$true] %s14_s29 }
   0x2   :  { %1934 = sst [smem:[#allocation26_spill]] %s1920_s4 }
   0x3   :  { %1935 = sst [smem:[#allocation27_spill]] %s1921_s5 }
   0x4   :  { %1936 = sst [smem:[#allocation28_spill]] %s1922_s6 }
   0x5   :  { %1937 = sst [smem:[#allocation29_spill]] %s1923_s7 }
   0x6   :  { %17 = dma.hbm_to_smem %s15_s29, 16, %s1542_s30, [#allocation2] }
   0x7   :  { %1504 = dma.done.wait [#allocation2], 16 }
   0x8   :  { %1505 = vsyncadd [#allocation2], 4294967280 }
   0x9   :  { %20 = sfence }
   0xa   :  { %21 = vsyncpa [#allocation5], 0 }
   0xb   :  { %23 = vsyncpa [#allocation5 + $0x1], 0 }
   0xc   :  { %24 = vsyncpa [#allocation8], 0 }
   0xd   :  { %26 = vsyncpa [#allocation8 + $0x1], 0 }
   0xe   :  { %27 = vsyncpa [#allocation11], 0 }
   0xf   :  { %28 = vsyncpa [#allocation14], 0 }
  0x10   :  { %29 = vsyncpa [#allocation6], 0 }
  0x11   :  { %31 = vsyncpa [#allocation6 + $0x1], 0  ;;  %s1603_s9 = smov 0   ;;  %s1605_s10 = smov 0  }
  0x12   :  { %s1607_s11 = smov 0   ;;  %s1609_s0 = smov 0  }
  0x13 LB: > { %s1938_s4 = sld [smem:[#allocation26_spill]]  ;;  %s1627_s15 = sadd.s32 4294967295, %s1540_s0   ;;  %s1540_s0 = sphi %s1609_s0, %s1961_s0   ;;  %s1536_s11 = sphi %s1607_s11, %s1965_s11   ;;  %s1532_s10 = sphi %s1605_s10, %s1964_s10   ;;  %s1528_s9 = sphi %s1603_s9, %s1963_s9  }
  0x14   : > { %p1059_p0 = scmp.ge.s32.totalorder %s1540_s0, 1  ;;  %p1930_p1 = scmp.eq.s32.totalorder %s1627_s15, 0 }
  0x15   : > { %p230_p2 = scmp.lt.s32.totalorder %s1540_s0, 3  ;;  %s1543_s17 = smov [#allocation10]  }
  0x16   : > { %s243_s18 = sshll.u32 %s1543_s17, 4  ;;  %s1940_s6 = sld [smem:[#allocation28_spill]]  ;;  %s244_s18 = int_to_ptr.vmem [resolvable:$true] %s243_s18 }
  0x17   : > { %p1632_p3 = pnand %p1059_p0, %p230_p2  ;;  %s1544_s23 = smov [#allocation13]  }
  0x18   : > { %s271_s24 = sshll.u32 %s1544_s23, 4  ;;  %s1925_s25 = smov 128   ;;  %s272_s24 = int_to_ptr.vmem [resolvable:$true] %s271_s24 }
  0x19   : > { %s241_s14 = sshll.u32 %s1938_s4, 4  ;;  %p1140_p4 = pneg %p1632_p3  ;;  %s242_s14 = int_to_ptr.hbm [resolvable:$true] %s241_s14 }
  0x1a   : > { %s1927_s26 = smov 8   ;;  %s1058_s27 = sadd.s32 4294967294, %s1540_s0  }
  0x1b   : > { %p1644_p6 = pnand %p1140_p4, %p1930_p1  ;;  %s1660_s28 = sadd.s32 1, %s1540_s0  }
  0x1c   : > { %s269_s21 = sshll.u32 %s1940_s6, 4  ;;  %1942 = sst [smem:[#allocation23_spill]] %s1660_s28  ;;  %s270_s21 = int_to_ptr.hbm [resolvable:$true] %s269_s21 }
  0x1d   : > { %1143 = dma.hbm_to_vmem [thread:$0]  (!%p1644_p6), %s242_s14, 512, %s244_s18, [#allocation11], %s1925_s25, %s1925_s25, %s1927_s26  }
  0x1e   : > { %1149 = dma.hbm_to_vmem [thread:$0]  (!%p1644_p6), %s270_s21, 512, %s272_s24, [#allocation14], %s1925_s25, %s1925_s25, %s1927_s26  }
  0x1f   : > { %s41_s29 = ssub.s32 %s1540_s0, %s1660_s28  ;;  %s44_s30 = sadd.s32 1, %s1536_s11 }
  0x20   : > { %p42_p7 = scmp.eq.s32.totalorder %s41_s29, 0  ;;  %p51_p8 = scmp.ne.s32.totalorder %s1536_s11, %s1532_s10 }
  0x21   : > { %p52_p9 = scmp.eq.s32.totalorder %s1540_s0, 0  ;;  %p57_p10 = scmp.ne.s32.totalorder %s1532_s10, %s1528_s9 }
  0x22   : > { %s1671_s12 = scalar_select %p42_p7, %s1536_s11, %s44_s30  }
  0x23   : > { %p53_p11 = por %p52_p9, %p51_p8  ;;  %p1675_p12 = por %p1930_p1, %p57_p10 }
  0x24   : > { %1943 = sst [smem:[#allocation24_spill]] %s1671_s12  ;;  %p217_p13 = scmp.eq.s32.totalorder %s1627_s15, 1 }
  0x25   : > { %p223_p0 = scmp.eq.s32.totalorder %s1058_s27, 1  ;;  %p1171_p2 = scmp.lt.s32.totalorder %s1540_s0, 2 }
  0x26   : > { %s1929_s14 = sand.u32 1, %s1536_s11   ;;  %p1682_p4 = por %p217_p13, %p51_p8 }
  0x27   : > { %p1686_p5 = por %p223_p0, %p57_p10  ;;  %s1692_s19 = sshll.u32 %s1929_s14, 3 }
  0x28   : > { %s1695_s20 = sshll.u32 %s1540_s0, 3  ;;  %p1697_p7 = pnand %p1171_p2, %p53_p11 }
  0x29   : > { %s318_s23 = sand.u32 1, %s1540_s0   ;;  %s1948_s2 = sld [smem:[#allocation25_spill]] }
  0x2a   : > { %s322_s25 = scalar_lea.vmem [#allocation7], %s1692_s19  ;;  %s1707_s14 = scalar_lea.sflag [#allocation8], %s318_s23 }
  0x2b   : > { %s330_s26 = sshll.u32 %s322_s25, 4  ;;  %p1314_p9 = pneg %p1697_p7  ;;  %s331_s26 = int_to_ptr.vmem [resolvable:$true] %s330_s26 }
  0x2f   : > { %s326_s29 = scalar_lea.hbm %s1948_s2, %s1695_s20  ;;  %s1317_s27 = scalar_lea.hbm %s1948_s2, 16 }
  0x30   : > { %s328_s30 = sshll.u32 %s326_s29, 4  ;;  %s329_s30 = int_to_ptr.hbm [resolvable:$true] %s328_s30 }
  0x31   : > { %s1310_s4 = sshra.s32 %s329_s30, 4  ;;  %s1311_s4 = int_to_ptr.hbm [resolvable:$true] %s1310_s4 }
  0x32   : > { %s1312_s6 = scalar_lea.hbm %s1311_s4, 8  ;;  %p1318_p13 = scmp.lt.s32.totalorder %s1311_s4, %s1948_s2 }
  0x33   : > { %p1313_p8 = scmp.ne.s32.totalorder %s1311_s4, %s1312_s6  ;;  %p1319_p0 = scmp.lt.s32.totalorder %s1317_s27, %s1312_s6 }
  0x35   : > { %p1315_p10 = pnand %p1314_p9, %p1313_p8  ;;  %p1320_p2 = por %p1319_p0, %p1318_p13 }
  0x37   : > { %p1316_p11 = pneg %p1315_p10 }
  0x39   : > { %p1321_p1 = pnand %p1320_p2, %p1316_p11 }
  0x3b   : > { %1324 = shalt.err (!%p1321_p1)
}
  0x3c   : > { %1159 = dma.hbm_to_vmem [thread:$0]  (!%p1697_p7), %s329_s30, 128, %s331_s26, %s1707_s14  }
  0x3d   : > { %s1949_s5 = sld [smem:[#allocation27_spill]]  ;;  %s1547_s24 = smov [#allocation12]  }
  0x3e   : > { %s257_s4 = sshll.u32 %s1547_s24, 4  ;;  %s1950_s7 = sld [smem:[#allocation29_spill]]  ;;  %s258_s4 = int_to_ptr.vmem [resolvable:$true] %s257_s4 }
  0x3f   : > { %s1951_s25 = smov 8   ;;  %s1952_s2 = smov 128  }
  0x40   : > { %s1548_s26 = smov [#allocation15]   ;;  %s307_s24 = scalar_lea.hbm %s1917_s1, %s1695_s20 }
  0x41   : > { %s285_s30 = sshll.u32 %s1548_s26, 4  ;;  %s303_s6 = scalar_lea.vmem [#allocation4], %s1692_s19  ;;  %s286_s30 = int_to_ptr.vmem [resolvable:$true] %s285_s30 }
  0x42   : > { %s311_s27 = sshll.u32 %s303_s6, 4  ;;  %s312_s27 = int_to_ptr.vmem [resolvable:$true] %s311_s27 }
  0x43   : > { %s255_s12 = sshll.u32 %s1949_s5, 4  ;;  %s309_s5 = sshll.u32 %s307_s24, 4  ;;  %s256_s12 = int_to_ptr.hbm [resolvable:$true] %s255_s12  ;;  %s310_s5 = int_to_ptr.hbm [resolvable:$true] %s309_s5 }
  0x44   : > { %s283_s29 = sshll.u32 %s1950_s7, 4  ;;  %s1400_s7 = sshra.s32 %s310_s5, 4  ;;  %s284_s29 = int_to_ptr.hbm [resolvable:$true] %s283_s29  ;;  %s1401_s7 = int_to_ptr.hbm [resolvable:$true] %s1400_s7 }
  0x45   : > { %1146 = dma.hbm_to_vmem [thread:$0]  (!%p1644_p6), %s256_s12, 512, %s258_s4, [#allocation11], %s1952_s2, %s1952_s2, %s1951_s25  }
  0x46   : > { %1152 = dma.hbm_to_vmem [thread:$0]  (!%p1644_p6), %s284_s29, 512, %s286_s30, [#allocation14], %s1952_s2, %s1952_s2, %s1951_s25  }
  0x47   : > { %s1953_s12 = sand.u32 1, %s1536_s11   ;;  %s1402_s26 = scalar_lea.hbm %s1401_s7, 8 }
  0x48   : > { %s300_s4 = scalar_lea.sflag [#allocation5], %s1953_s12  ;;  %p1403_p1 = scmp.ne.s32.totalorder %s1401_s7, %s1402_s26 }
  0x49   : > { %s1407_s29 = scalar_lea.hbm %s1917_s1, 16  ;;  %p1408_p6 = scmp.lt.s32.totalorder %s1401_s7, %s1917_s1 }
  0x4a   : > { %p1405_p8 = pnand %p1403_p1, %p1314_p9  ;;  %p1409_p11 = scmp.lt.s32.totalorder %s1407_s29, %s1402_s26 }
  0x4c   : > { %p1406_p10 = pneg %p1405_p8  ;;  %p1410_p13 = por %p1409_p11, %p1408_p6 }
  0x4e   : > { %p1411_p0 = pnand %p1410_p13, %p1406_p10 }
  0x50   : > { %1414 = shalt.err (!%p1411_p0)
}
  0x51   : > { %1156 = dma.hbm_to_vmem [thread:$0]  (!%p1697_p7), %s310_s5, 128, %s312_s27, %s300_s4  }
  0x52   : > { %s345_s24 = scalar_lea.hbm %s1919_s3, %s1695_s20  ;;  %s341_s6 = scalar_lea.vmem [#allocation9], %s1692_s19 }
  0x53   : > { %s349_s12 = sshll.u32 %s341_s6, 4  ;;  %s347_s2 = sshll.u32 %s345_s24, 4  ;;  %s350_s12 = int_to_ptr.vmem [resolvable:$true] %s349_s12  ;;  %s348_s2 = int_to_ptr.hbm [resolvable:$true] %s347_s2 }
  0x54   : > { %s1430_s7 = sshra.s32 %s348_s2, 4  ;;  %s1437_s5 = scalar_lea.hbm %s1919_s3, 16  ;;  %s1431_s7 = int_to_ptr.hbm [resolvable:$true] %s1430_s7 }
  0x55   : > { %s1432_s26 = scalar_lea.hbm %s1431_s7, 8  ;;  %p1438_p10 = scmp.lt.s32.totalorder %s1431_s7, %s1919_s3 }
  0x56   : > { %p1433_p2 = scmp.ne.s32.totalorder %s1431_s7, %s1432_s26  ;;  %p1439_p6 = scmp.lt.s32.totalorder %s1437_s5, %s1432_s26 }
  0x58   : > { %p1435_p1 = pnand %p1433_p2, %p1314_p9  ;;  %p1440_p11 = por %p1439_p6, %p1438_p10 }
  0x5a   : > { %p1436_p8 = pneg %p1435_p1 }
  0x5c   : > { %p1441_p13 = pnand %p1440_p11, %p1436_p8 }
  0x5e   : > { %1444 = shalt.err (!%p1441_p13)
}
  0x5f   : > { %1162 = dma.hbm_to_vmem [thread:$0]  (!%p1697_p7), %s348_s2, 128, %s350_s12, %s1707_s14  }
  0x60   : > { %358 = sbr.rel (%p1632_p3) target bundleno = 1441 (0x5a1), region = 48  ;;  %s1777_s19 = sand.u32 (!%p1632_p3), 1, %s1532_s10  }
  0x61   : > { %s1780_s20 = sshll.u32 (!%p1632_p3), %s1777_s19, 3  ;;  %s361_s25 = scalar_lea.sflag (!%p1632_p3), [#allocation5], %s1777_s19 }
  0x62   : > { %s364_s30 = scalar_lea.vmem (!%p1632_p3), [#allocation4], %s1780_s20 }
  0x65   : > { %1507 = dma.done.wait (%p1675_p12), %s361_s25, 128  }
  0x66   : > { %1509 = vsyncadd (%p1675_p12), %s361_s25, 4294967168  ;;  %s370_s16 = sand.u32 1, %s1627_s15   ;;  %s374_s21 = scalar_lea.vmem [#allocation7], %s1780_s20 }
  0x67   : > { %s371_s14 = scalar_lea.sflag [#allocation8], %s370_s16 }
  0x68   : > { %1511 = dma.done.wait (%p1675_p12), %s371_s14, 256  }
  0x69   : > { %1513 = vsyncadd (%p1675_p12), %s371_s14, 4294967040  ;;  %s384_s28 = scalar_lea.vmem [#allocation9], %s1780_s20  ;;  %p1954_p3 = scmp.eq.s32.totalorder %s1627_s15, 0 }
  0x6b   : > { %1515 = dma.done.wait (%p1954_p3), [#allocation11], 1024   ;;  %p1955_p7 = pmov %p1954_p3 }
  0x6c   : > { %p1956_p9 = pmov %p1954_p3 }
  0x6d   : > { %1517 = vsyncadd (%p1955_p7), [#allocation11], 4294966272 }
  0x6e   : > { %1519 = dma.done.wait (%p1956_p9), [#allocation14], 1024   ;;  %p1957_p0 = pmov %p1954_p3 }
  0x6f   : > { %vm453_vm0 = vcmask 261120   ;;  %v452_v0 = vld [vmem:[#allocation10 + $0x18] sm:$0xff]  ;;  %v451_v2 = vld [vmem:[#allocation10 + $0x10] sm:$0xff]  ;;  %v450_v6 = vld [vmem:[#allocation10 + $0x8] sm:$0xff]  ;;  %vm573_vm1 = vcmask 64512   ;;  %s1549_s13 = smov 120   ;;  %v569_v22 = vlaneseq }
  0x70   : > { %1521 = vsyncadd (%p1957_p0), [#allocation14], 4294966272  ;;  %v492_v1 = vld [vmem:[#allocation12 + $0x18] sm:$0xff]  ;;  %1080 = vmatpush.xpose.msk.msra.mxu0 %vm453_vm0, %v452_v0  ;;  %v491_v3 = vld [vmem:[#allocation12 + $0x10] sm:$0xff]  ;;  %s1550_s23 = smov 112   ;;  %s1551_s24 = smov 104  }
  0x71   : > { %1085 = vmatpush.xpose.msk.msra.mxu1 %vm453_vm0, %v492_v1  ;;  %v531_v4 = vld [vmem:[#allocation13 + $0x18] sm:$0xff]  ;;  %v530_v5 = vld [vmem:[#allocation13 + $0x10] sm:$0xff]  ;;  %v490_v7 = vld [vmem:[#allocation12 + $0x8] sm:$0xff]  ;;  %s568_s6 = sld [smem:[#allocation3 + %s1627_s15]]  ;;  %v570_v24 = vand.u32 127, %v569_v22  ;;  %s1552_s12 = smov 8  }
  0x72   : > { %1090 = vmatpush.xpose.msk.msra.mxu2 %vm453_vm0, %v531_v4  ;;  %v529_v8 = vld [vmem:[#allocation13 + $0x8] sm:$0xff]  ;;  %v449_v9 = vld [vmem:[#allocation10] sm:$0xff]  ;;  %v446_v11 = vld [vmem:[%s364_s30] sm:$0xff]  ;;  %s1553_s2 = smov 24   ;;  %s1554_s7 = smov 16   ;;  %vm847_vm3 = vcmask 130048  }
  0x73   : > { %v489_v10 = vld [vmem:[#allocation12] sm:$0xff]  ;;  %v448_v14 = vld [vmem:[%s384_s28] sm:$0xff]  ;;  %vm849_vm4 = vcmask 195584   ;;  %s1113_s26 = sshll.u32 %s1627_s15, 3  ;;  %s445_s27 = scalar_lea.vmem [#allocation16], %s1780_s20 }
  0x74   : > { %1081 = vmatpush.xpose.msk.msra.mxu0 %vm453_vm0, %v451_v2  ;;  %v447_v12 = vld [vmem:[%s374_s21] sm:$0xff]  ;;  %s902_s5 = scalar_lea.hbm %s1924_s8, %s1113_s26  ;;  %s904_s4 = sshll.u32 %s445_s27, 4  ;;  %s905_s4 = int_to_ptr.vmem [resolvable:$true] %s904_s4 }
  0x75   : > { %1086 = vmatpush.xpose.msk.msra.mxu1 %vm453_vm0, %v491_v3  ;;  %v528_v13 = vld [vmem:[#allocation13] sm:$0xff]  ;;  %s906_s25 = sshll.u32 %s902_s5, 4  ;;  %s892_s30 = scalar_lea.sflag [#allocation6], %s1777_s19  ;;  %s907_s25 = int_to_ptr.hbm [resolvable:$true] %s906_s25 }
  0x76   : > { %1091 = vmatpush.xpose.msk.msra.mxu2 %vm453_vm0, %v530_v5  ;;  %s1474_s16 = sshra.s32 %s907_s25, 4  ;;  %s1480_s28 = scalar_lea.hbm %s1924_s8, 16  ;;  %s1475_s16 = int_to_ptr.hbm [resolvable:$true] %s1474_s16 }
  0x77   : > { %v571_v25 = vstv %s568_s6  ;;  %s1476_s14 = scalar_lea.hbm %s1475_s16, 8  ;;  %p1481_p8 = scmp.lt.s32.totalorder %s1475_s16, %s1924_s8 }
  0x78   : > { %1082 = vmatpush.xpose.msk.msra.mxu0 %vm453_vm0, %v450_v6  ;;  %vm1838_vm2 = vcmp.lt.s32.totalorder %v570_v24, %v571_v25  ;;  %p1477_p12 = scmp.ne.s32.totalorder %s1475_s16, %s1476_s14  ;;  %p1482_p10 = scmp.lt.s32.totalorder %s1480_s28, %s1476_s14 }
  0x79   : > { %1087 = vmatpush.xpose.msk.msra.mxu1 %vm453_vm0, %v490_v7 }
  0x7a   : > { %1092 = vmatpush.xpose.msk.msra.mxu2 %vm453_vm0, %v529_v8  ;;  %p1478_p2 = pnand %p1477_p12, %p1682_p4  ;;  %p1483_p6 = por %p1482_p10, %p1481_p8 }
  0x7c   : > { %1083 = vmatpush.xpose.msk.msra.mxu0 %vm453_vm0, %v449_v9  ;;  %p1479_p1 = pneg %p1478_p2 }
  0x7d   : > { %1088 = vmatpush.xpose.msk.msra.mxu1 %vm453_vm0, %v489_v10 }
  0x7e   : > { %1093 = vmatpush.xpose.msk.msra.mxu2 %vm453_vm0, %v528_v13  ;;  %p1484_p11 = pnand %p1483_p6, %p1479_p1 }
  0x7f   : > { %1084 = vmatmul.msk.f32.vlgmr.msra.gmra.mxu0 %vm453_vm0, %v446_v11 }
  0x80   : > { %1089 = vmatmul.msk.f32.vlgmr.msra.gmra.mxu1 %vm453_vm0, %v447_v12 }
  0x81   : > { %1094 = vmatmul.msk.f32.vlgmr.msra.gmra.mxu2 %vm453_vm0, %v448_v14 }
  0xfc   : > { %v486_v15 = vpop.f32.mrf.mxu0 }
  0xfd   : > { %v525_v16 = vpop.f32.mrf.mxu1  ;;  %v567_v17 = vmul.f32 0.35355338, %v486_v15 }
  0xfe   : > { %637 = vrot.lane.b32.xlu1 %v525_v16, %s1549_s13  ;;  %1095 = vmatpush.xpose.msk.msra.mxu3 %vm573_vm1, %v525_v16 }
  0xff   : > { %635 = vrot.lane.b32.xlu2 %v567_v17, %s1549_s13 }
 0x101   : > { %1096 = vmatmul.msk.f32.vlgmr.msra.gmra.mxu3 %vm573_vm1, %v567_v17 }
 0x104   : > { %v1831_v18 = vpop.f32.mrf.mxu2 }
 0x105   : > { %630 = vmatpush.msrb.mxu3 %v1831_v18 }
 0x106   : > { %704 = vrot.lane.b32.xlu1 %v525_v16, %s1550_s23 }
 0x107   : > { %702 = vrot.lane.b32.xlu2 %v567_v17, %s1550_s23 }
 0x10e   : > { %768 = vrot.lane.b32.xlu1 %v567_v17, %s1551_s24  ;;  %v853_v17 = vld [vmem:[#allocation15 + $0x10] sm:$0xff] }
 0x159   : > { %v636_v20 = vpop.permute.xlu2 %635 }
 0x161   : > { %v703_v23 = vpop.permute.xlu2 %702 }
 0x170   : > { %v638_v19 = vpop.permute.xlu1 %637 }
 0x171   : > { %1098 = vmatpush.xpose.msk.msra.mxu3 %vm573_vm1, %v638_v19  ;;  %v851_v19 = vld [vmem:[#allocation15] sm:$0xff] }
 0x178   : > { %v705_v21 = vpop.permute.xlu1 %704 }
 0x179   : > { %1101 = vmatpush.xpose.msk.msrb.mxu2 %vm573_vm1, %v705_v21 }
 0x17c   : > { %1102 = vmatmul.msk.f32.vlgmr.msrb.gmra.mxu2 %vm573_vm1, %v703_v23 }
 0x180   : > { %v769_v42 = vpop.permute.xlu1 %768 }
 0x184   : > { %v597_v27 = vpop.f32.mrf.mxu3 }
 0x185   : > { %v600_v28 = vsel %vm1838_vm2, %v597_v27, -1000000.0 }
 0x186   : > { %v601_v29 = vsel %vm573_vm1, %v600_v28, -inf }
 0x187   : > { %602 = vmax.xlane.f32.xlu0 %v601_v29 }
 0x1fa   : > { %v603_v30 = vpop.xlane.xlu0 %602 }
 0x1fb   : > { %v604_v31 = vsub.f32 %v600_v28, %v603_v30 }
 0x1fd   : > { %v605_v32 = vmul.f32 1.442695, %v604_v31 }
 0x1ff   : > { %1222 = vpow2.f32 %v605_v32  ;;  %v727_v33 = vpop.f32.mrf.mxu2 }
 0x200   : > { %v730_v34 = vsel %vm1838_vm2, %v727_v33, -1000000.0 }
 0x201   : > { %v731_v35 = vsel %vm573_vm1, %v730_v34, -inf }
 0x202   : > { %732 = vmax.xlane.f32.xlu1 %v731_v35 }
 0x205   : > { %v1223_v36 = vpop.eup %1222 }
 0x206   : > { %v607_v37 = vsel %vm573_vm1, %v1223_v36, 0.0 }
 0x207   : > { %608 = vadd.xlane.f32.xlu0 %v607_v37 }
 0x21b   : > { %770 = vrot.lane.b32.xlu0 %v525_v16, %s1551_s24  ;;  %v854_v16 = vld [vmem:[#allocation15 + $0x18] sm:$0xff] }
 0x21c   : > { %1107 = vmatpush.xpose.msk.msrb.mxu1 %vm453_vm0, %v854_v16 }
 0x220   : > { %1108 = vmatpush.xpose.msk.msrb.mxu1 %vm453_vm0, %v853_v17 }
 0x275   : > { %v733_v43 = vpop.xlane.xlu1 %732 }
 0x276   : > { %v734_v45 = vsub.f32 %v730_v34, %v733_v43 }
 0x278   : > { %v735_v46 = vmul.f32 1.442695, %v734_v45 }
 0x27a   : > { %v609_v38 = vpop.xlane.xlu0 %608 }
 0x27b   : > { %1224 = vrcp.f32 %v609_v38 }
 0x27c   : > { %1226 = vpow2.f32 %v735_v46 }
 0x281   : > { %v1225_v39 = vpop.eup %1224 }
 0x282   : > { %v611_v40 = vmul.f32 %v1225_v39, %v1223_v36  ;;  %v1227_v50 = vpop.eup %1226 }
 0x283   : > { %v737_v53 = vsel %vm573_vm1, %v1227_v50, 0.0 }
 0x284   : > { %1097 = vmatmul.msk.f32.vlgmr.msrb.gmra.mxu3 %vm573_vm1, %v611_v40 }
 0x28c   : > { %1099 = vmatmul.msk.f32.vlgmr.msra.gmra.mxu3 %vm573_vm1, %v636_v20 }
 0x28d   : > { %v771_v41 = vpop.permute.xlu0 %770 }
 0x28e   : > { %1104 = vmatpush.xpose.msk.msrb.mxu3 %vm573_vm1, %v771_v41 }
 0x294   : > { %1105 = vmatmul.msk.f32.vlgmr.msrb.gmra.mxu3 %vm573_vm1, %v769_v42 }
 0x307   : > { %v1854_v44 = vpop.f32.mrf.mxu3 }
 0x30f   : > { %v660_v47 = vpop.f32.mrf.mxu3 }
 0x310   : > { %v663_v48 = vsel %vm1838_vm2, %v660_v47, -1000000.0 }
 0x311   : > { %v664_v49 = vsel %vm573_vm1, %v663_v48, -inf }
 0x312   : > { %665 = vmax.xlane.f32.xlu2 %v664_v49 }
 0x317   : > { %v793_v51 = vpop.f32.mrf.mxu3 }
 0x318   : > { %v796_v52 = vsel %vm1838_vm2, %v793_v51, -1000000.0 }
 0x319   : > { %v797_v54 = vsel %vm573_vm1, %v796_v52, -inf }
 0x31a   : > { %738 = vadd.xlane.f32.xlu2 %v737_v53  ;;  %798 = vmax.xlane.f32.xlu0 %v797_v54 }
 0x32e   : > { %808 = vrot.lane.b32.xlu0 %v1831_v18, %s1551_s24 }
 0x385   : > { %v666_v55 = vpop.xlane.xlu2 %665 }
 0x386   : > { %v667_v56 = vsub.f32 %v663_v48, %v666_v55 }
 0x388   : > { %v668_v57 = vmul.f32 1.442695, %v667_v56 }
 0x38a   : > { %1228 = vpow2.f32 %v668_v57 }
 0x38d   : > { %v799_v58 = vpop.xlane.xlu0 %798  ;;  %v739_v1 = vpop.xlane.xlu2 %738 }
 0x38e   : > { %v800_v59 = vsub.f32 %v796_v52, %v799_v58 }
 0x390   : > { %v1229_v60 = vpop.eup %1228  ;;  %v801_v61 = vmul.f32 1.442695, %v800_v59 }
 0x391   : > { %v670_v62 = vsel %vm573_vm1, %v1229_v60, 0.0 }
 0x392   : > { %1230 = vpow2.f32 %v801_v61  ;;  %671 = vadd.xlane.f32.xlu2 %v670_v62 }
 0x398   : > { %v1231_v63 = vpop.eup %1230 }
 0x399   : > { %v803_v0 = vsel %vm573_vm1, %v1231_v63, 0.0 }
 0x39a   : > { %804 = vadd.xlane.f32.xlu1 %v803_v0 }
 0x3a0   : > { %v809_v7 = vpop.permute.xlu0 %808 }
 0x3aa   : > { %676 = vrot.lane.b32.xlu2 %v1831_v18, %s1549_s13 }
 0x3b3   : > { %742 = vrot.lane.b32.xlu1 %v1831_v18, %s1550_s23  ;;  %v852_v18 = vld [vmem:[#allocation15 + $0x8] sm:$0xff] }
 0x3b4   : > { %1109 = vmatpush.xpose.msk.msrb.mxu1 %vm453_vm0, %v852_v18 }
 0x3b8   : > { %1110 = vmatpush.xpose.msk.msrb.mxu1 %vm453_vm0, %v851_v19 }
 0x405   : > { %v672_v2 = vpop.xlane.xlu2 %671 }
 0x406   : > { %1232 = vrcp.f32 %v672_v2 }
 0x40c   : > { %v1233_v3 = vpop.eup %1232 }
 0x40d   : > { %v677_v4 = vpop.permute.xlu2 %676  ;;  %v805_v5 = vpop.xlane.xlu1 %804  ;;  %v674_v6 = vmul.f32 %v1233_v3, %v1229_v60 }
 0x40e   : > { %1234 = vrcp.f32 %v805_v5  ;;  %697 = vmatpush.msrb.mxu0 %v677_v4 }
 0x40f   : > { %1100 = vmatmul.msk.f32.vlgmr.msrb.gmra.mxu0 %vm573_vm1, %v674_v6  ;;  %1236 = vrcp.f32 %v739_v1 }
 0x410   : > { %829 = vmatpush.msra.mxu0 %v809_v7 }
 0x414   : > { %v1235_v8 = vpop.eup %1234 }
 0x415   : > { %v807_v9 = vmul.f32 %v1235_v8, %v1231_v63  ;;  %v1237_v10 = vpop.eup %1236 }
 0x416   : > { %v741_v11 = vmul.f32 %v1237_v10, %v1227_v50 }
 0x417   : > { %1106 = vmatmul.msk.f32.vlgmr.msra.gmra.mxu0 %vm573_vm1, %v807_v9 }
 0x425   : > { %v743_v12 = vpop.permute.xlu1 %742 }
 0x426   : > { %763 = vmatpush.msra.mxu2 %v743_v12 }
 0x427   : > { %1103 = vmatmul.msk.f32.vlgmr.msra.gmra.mxu2 %vm573_vm1, %v741_v11 }
 0x48c   : > { %v699_v13 = vpop.f32.mrf.mxu0 }
 0x48d   : > { %835 = vrot.lane.b32.xlu2 %v699_v13, %s1552_s12 }
 0x494   : > { %v831_v14 = vpop.f32.mrf.mxu0 }
 0x495   : > { %843 = vrot.lane.b32.xlu1 %v831_v14, %s1553_s2 }
 0x4aa   : > { %v765_v15 = vpop.f32.mrf.mxu2 }
 0x4ab   : > { %839 = vrot.lane.b32.xlu0 %v765_v15, %s1554_s7 }
 0x4e7   : > { %v836_v20 = vpop.permute.xlu2 %835 }
 0x4e8   : > { %v846_v21 = vsel %vm573_vm1, %v1854_v44, %v836_v20 }
 0x507   : > { %v844_v23 = vpop.permute.xlu1 %843 }
 0x51d   : > { %v840_v22 = vpop.permute.xlu0 %839 }
 0x51e   : > { %v848_v24 = vsel %vm847_vm3, %v846_v21, %v840_v22 }
 0x51f   : > { %v850_v25 = vsel %vm849_vm4, %v848_v24, %v844_v23 }
 0x520   : > { %1111 = vmatmul.msk.f32.vlgmr.msrb.gmra.mxu1 %vm453_vm0, %v850_v25 }
 0x59d   : > { %v887_v26 = vpop.f32.mrf.mxu1 }
 0x59e   : > { %890 = vst.msk [vmem:[%s445_s27] sm:$0xff] %vm453_vm0, %v887_v26 }
 0x59f   : > { %1487 = shalt.err (!%p1484_p11)
}
 0x5a0   : > { %1138 = dma.vmem_to_hbm [thread:$0]  (%p1682_p4), %s905_s4, 128, %s907_s25, %s892_s30  }
 0x5a1 PF: > { %s918_s19 = sand.u32 1, %s1528_s9   ;;  %p1960_p13 = scmp.ge.s32.totalorder %s1540_s0, 2 }
 0x5a2   : > { %s919_s23 = scalar_lea.sflag [#allocation6], %s918_s19 }
 0x5a3   : > { %p1164_p3 = pnand %p1960_p13, %p1686_p5 }
 0x5a5   : > { %p1165_p7 = pneg %p1164_p3 }
 0x5a7   : > { %1523 = dma.done.wait (%p1165_p7), %s919_s23, 128  }
 0x5a8   : > { %1525 = vsyncadd (%p1165_p7), %s919_s23, 4294967168  ;;  %s1961_s0 = sld [smem:[#allocation23_spill]]  ;;  %s1963_s9 = smov %s1532_s10 }
 0x5a9   : > { %s1962_s24 = sld [smem:[#allocation24_spill]]  ;;  %s1964_s10 = smov %s1536_s11 }
 0x5ae   : > { %p34_p9 = scmp.ge.s32.totalorder %s1961_s0, 4  }
 0x5af   : > { %s1965_s11 = smov %s1962_s24 }
 0x5b0   :  { %36 = sbr.rel (!%p34_p9) target bundleno = 19 (0x13), region = 133 }
 0x5b5   :  { %925 = vsyncpa [#allocation5], 1 }
 0x5b6   :  { %927 = vsyncpa [#allocation5 + $0x1], 1 }
 0x5b7   :  { %928 = vsyncpa [#allocation8], 1 }
 0x5b8   :  { %930 = vsyncpa [#allocation8 + $0x1], 1 }
 0x5b9   :  { %931 = vsyncpa [#allocation11], 1 }
 0x5ba   :  { %932 = vsyncpa [#allocation14], 1 }
 0x5bb   :  { %933 = vsyncpa [#allocation6], 1 }
 0x5bc   :  { %935 = vsyncpa [#allocation6 + $0x1], 1 }

</bundles_post_ra>
